<compile_context>
chip_gen: v7x
topology: tpu7x:2x2x1
jax: 0.10.0
libtpu: 0.0.40
codegen_flags: <defaults>
</compile_context>

<pallas_src>
import math

import jax
import jax.numpy as jnp
from jax.experimental import pallas as pl
from jax.experimental.pallas import tpu as pltpu


# Scoped-VMEM limit: == v6e/v7x default (32 MiB), raises v5e's 16 MiB default.
# Our tile budget keeps the double-buffered live set well under this on all
# three generations (and under v7x's 64 MiB physical per core).
_VMEM_LIMIT_BYTES = 32 << 20


def make_positional_encoding_buffer(d_model: int, max_len: int = 5000,
                                    dtype=jnp.float32) -> jax.Array:
    """Deterministic pe buffer, identical to the PyTorch __init__.

    Build it directly in the activation dtype (e.g. bf16) so the kernel's HBM
    traffic stays narrow — the add is HBM-bound on every TPU generation.
    Returns shape (max_len, 1, d_model), matching the registered buffer.
    """
    position = jnp.arange(max_len, dtype=jnp.float32)[:, None]            # (L, 1)
    div_term = jnp.exp(
        jnp.arange(0, d_model, 2, dtype=jnp.float32) *
        (-math.log(10000.0) / d_model))                                   # (D/2,)
    pe = jnp.zeros((max_len, d_model), dtype=jnp.float32)
    pe = pe.at[:, 0::2].set(jnp.sin(position * div_term))
    pe = pe.at[:, 1::2].set(jnp.cos(position * div_term))
    # pe.unsqueeze(0).transpose(0, 1) -> (max_len, 1, d_model)
    return pe[:, None, :].astype(dtype)


def _add_pe_kernel(x_ref, pe_ref, o_ref):
    # x_ref / o_ref : (ts, B, D) tile of the activations / output
    # pe_ref        : (ts, D) dense tile of the positional-encoding table
    # Broadcast over the batch axis happens entirely in VMEM / VPU.
    o_ref[...] = x_ref[...] + pe_ref[...][:, None, :]


def _round_up(n: int, m: int) -> int:
    return -(-n // m) * m


def _sublane_multiple(dtype) -> int:
    # Packed-sublane granularity: f32 -> 8, bf16 -> 16, int8/fp8 -> 32.
    return max(8, 32 // jnp.dtype(dtype).itemsize)


def _choose_seq_tile(S: int, B: int, D: int, dtype,
                     target_bytes: int = 8 << 20) -> int:
    """Pick the sequence tile so the live VMEM tiles (x + out + pe) are ~8 MiB.

    With Pallas' default double buffering that is ~16-17 MiB peak, inside the
    32 MiB limit we request on every generation (v5e raised from its 16 MiB
    scoped default; v7x stays within its per-core 32 MiB scoped / 64 physical).
    """
    itemsize = jnp.dtype(dtype).itemsize
    sub = _sublane_multiple(dtype)
    # Padded VMEM bytes per sequence row: x and out tiles pad B -> sublane
    # multiple; the 2-D pe tile is dense (~1 row of D lanes, the "+1").
    row_bytes = (2 * _round_up(B, sub) + 1) * _round_up(D, 128) * itemsize
    ts = max(sub, target_bytes // row_bytes)   # >= sub even for fat rows
    ts = min(ts, S)
    if S >= sub:
        ts = max(sub, ts - ts % sub)           # keep pe's sublane block aligned
    return int(ts)


def positional_encoding_forward(x: jax.Array, pe: jax.Array,
                                *, donate_x: bool = False) -> jax.Array:
    """x: (S, B, D); pe: (max_len, 1, D) or (max_len, D).

    Returns x + pe[:S] broadcast over B (same semantics as the PyTorch forward).
    Set donate_x=True only if the caller does not need x afterwards; its HBM
    buffer is then aliased to the output.
    """
    S, B, D = x.shape
    if pe.ndim == 3:
        assert pe.shape[1] == 1 and pe.shape[2] == D, f"bad pe shape {pe.shape}"
        pe = pe.reshape(pe.shape[0], D)        # free (layout-compatible) reshape
    max_len = pe.shape[0]
    assert pe.shape == (max_len, D), f"pe shape {pe.shape} != ({max_len},{D})"
    assert S <= max_len, f"sequence length {S} exceeds pe max_len {max_len}"
    if pe.dtype != x.dtype:
        # Fallback cast; prefer building pe directly in the activation dtype.
        pe = pe.astype(x.dtype)

    sub = _sublane_multiple(x.dtype)
    ts = _choose_seq_tile(S, B, D, x.dtype)
    if S < sub:
        # Tiny-sequence path: slice pe to exactly S rows (negligible copy) so
        # the 2-D pe block equals its full array dims and the sublane
        # divisibility rule is trivially satisfied.
        pe = pe[:S]
        ts = S

    grid = (pl.cdiv(S, ts),)   # partial tail block is masked by Pallas

    return pl.pallas_call(
        _add_pe_kernel,
        out_shape=jax.ShapeDtypeStruct((S, B, D), x.dtype),
        grid_spec=pltpu.PrefetchScalarGridSpec(
            num_scalar_prefetch=0,
            grid=grid,
            in_specs=[
                # x tile: (ts, B, D); trailing dims equal the full array dims,
                # so this compiles for any (B, D) and is lane-dense whenever
                # D % 128 == 0 (true at real segformer widths 256/512/768).
                pl.BlockSpec((ts, B, D), lambda i: (i, 0, 0)),
                # pe tile: dense (ts, D) block straight out of the full
                # (max_len, D) table — no wrapper-side slice pass over HBM and
                # no 1->8 sublane padding.
                pl.BlockSpec((ts, D), lambda i: (i, 0)),
            ],
            out_specs=pl.BlockSpec((ts, B, D), lambda i: (i, 0, 0)),
        ),
        compiler_params=pltpu.CompilerParams(
            # Every sequence tile is independent -> shard across TCs on v7x.
            dimension_semantics=("parallel",),
            vmem_limit_bytes=_VMEM_LIMIT_BYTES),
        input_output_aliases=({0: 0} if donate_x else {}),
    )(x, pe)


if __name__ == "__main__":
    # Small shapes consistent with the module: seq=8, batch=2, d_model=32.
    S, B, D = 8, 2, 32
    MAX_LEN = 64

    key = jax.random.PRNGKey(0)
    x = jax.random.normal(key, (S, B, D), dtype=jnp.float32)
    pe = make_positional_encoding_buffer(D, MAX_LEN, dtype=jnp.float32)

    out = jax.block_until_ready(positional_encoding_forward(x, pe))

    # Pure-JAX reference for correctness (f32 path).
    ref = x + pe[:S]
    assert out.shape == (S, B, D)
    assert out.dtype == x.dtype
    assert jnp.allclose(out, ref, atol=1e-6, rtol=1e-6), "f32 mismatch vs reference"

    # Recommended production path: activations + pe in bf16 end-to-end
    # (halves HBM traffic; this kernel is purely HBM-bound). Looser tolerance
    # because the sin/cos table itself is stored in bf16.
    xb = x.astype(jnp.bfloat16)
    peb = make_positional_encoding_buffer(D, MAX_LEN, dtype=jnp.bfloat16)
    outb = jax.block_until_ready(positional_encoding_forward(xb, peb))
    refb = xb + peb[:S]
    assert outb.shape == (S, B, D)
    assert outb.dtype == jnp.bfloat16
    assert jnp.allclose(outb.astype(jnp.float32), refb.astype(jnp.float32),
                        atol=2e-2, rtol=2e-2), "bf16 mismatch vs reference"

    print("KERNEL_OK")
</pallas_src>

<mosaic_0001>
module attributes {stable_mosaic.version = 11 : i64} {
  func.func @_add_pe_kernel(%arg0: i32, %arg1: memref<8x2x32xf32, #tpu.memory_space<vmem>>, %arg2: memref<8x32xf32, #tpu.memory_space<vmem>>, %arg3: memref<8x2x32xf32, #tpu.memory_space<vmem>>) attributes {dimension_semantics = [#tpu.dimension_semantics<parallel>], iteration_bounds = array<i64: 1>, scalar_prefetch = 0 : i64, scratch_operands = 0 : i64, tpu.core_type = #tpu.core_type<tc>, window_params = [{transform_indices = @transform_0, window_bounds = array<i64: 8, 2, 32>}, {transform_indices = @transform_1, window_bounds = array<i64: 8, 32>}, {transform_indices = @transform_2, window_bounds = array<i64: 8, 2, 32>}]} {
    %c0 = arith.constant 0 : index
    %c0_0 = arith.constant 0 : index
    %c0_1 = arith.constant 0 : index
    %0 = vector.load %arg1[%c0, %c0_0, %c0_1] : memref<8x2x32xf32, #tpu.memory_space<vmem>>, vector<8x2x32xf32>
    %c0_2 = arith.constant 0 : index
    %c0_3 = arith.constant 0 : index
    %1 = vector.load %arg2[%c0_2, %c0_3] : memref<8x32xf32, #tpu.memory_space<vmem>>, vector<8x32xf32>
    %2 = vector.shape_cast %1 : vector<8x32xf32> to vector<8x1x32xf32>
    %3 = vector.broadcast %2 : vector<8x1x32xf32> to vector<8x2x32xf32>
    %4 = arith.addf %0, %3 : vector<8x2x32xf32>
    %c0_4 = arith.constant 0 : index
    %c0_5 = arith.constant 0 : index
    %c0_6 = arith.constant 0 : index
    %5 = vector.load %arg3[%c0_4, %c0_5, %c0_6] : memref<8x2x32xf32, #tpu.memory_space<vmem>>, vector<8x2x32xf32>
    tpu.vector_store %arg3[%c0_4, %c0_5, %c0_6], %4 {strides = array<i32>} : memref<8x2x32xf32, #tpu.memory_space<vmem>>, vector<8x2x32xf32>,
    return
  }
  func.func @transform_0(%arg0: i32) -> (i32, i32, i32) {
    %c0_i32 = arith.constant 0 : i32
    %c0_i32_0 = arith.constant 0 : i32
    %c0_i32_1 = arith.constant 0 : i32
    return %arg0, %c0_i32, %c0_i32_0 : i32, i32, i32
  }
  func.func @transform_1(%arg0: i32) -> (i32, i32) {
    %c0_i32 = arith.constant 0 : i32
    %c0_i32_0 = arith.constant 0 : i32
    return %arg0, %c0_i32 : i32, i32
  }
  func.func @transform_2(%arg0: i32) -> (i32, i32, i32) {
    %c0_i32 = arith.constant 0 : i32
    %c0_i32_0 = arith.constant 0 : i32
    %c0_i32_1 = arith.constant 0 : i32
    return %arg0, %c0_i32, %c0_i32_0 : i32, i32, i32
  }
}

</mosaic_0001>

<bundles_post_ra>
// kernel: tpu_custom_call.1
= control target key start
LH: loop header
LB: loop body
LE: loop exit
PB: predicated region body
PF: predicated region fallthrough
CT: control target
= control target key end

     0   :  { %v26_v1 = vlaneseq  ;;  %v172_v2 = vmov 1966171168   ;;  %s238_s0 = inlined_call_operand.vmem [shape: f32[8,2,32], index: 0, kind: input, shape index: {}]   ;;  %s239_s1 = inlined_call_operand.vmem [shape: f32[64,32], index: 1, kind: input, shape index: {}]   ;;  %s240_s2 = inlined_call_operand.hbm [shape: f32[8,2,32], index: 2, kind: output, shape index: {}]  }
   0x1   :  { %v20_v0 = vld [vmem:[%s239_s1] sm:$0xff]  ;;  %v24_v3 = vunpack.c.l.s4 %v172_v2 }
   0x2   :  { %v27_v4 = vshrl.u32 %v26_v1, 7  ;;  %v22_v6 = vcombine.high %v20_v0, %v20_v0 }
   0x3   :  { %v25_v5 = vunpack.c.0.s8 %v24_v3 }
   0x4   :  { %7 = vsyncpa [#allocation3], 0  ;;  %v73_v9 = vsub.s32 0, %v27_v4  ;;  %v12_v15 = vld [vmem:[%s238_s0] sm:$0x3]  ;;  %vm119_vm0 = vcmask 254976  }
   0x5   :  { %v28_v7 = vsub.s32 %v25_v5, %v27_v4  ;;  %v16_v19 = vld [vmem:[%s238_s0 + $0x8] sm:$0x3]  ;;  %v13_v21 = vld [vmem:[%s238_s0 + $0x2] sm:$0x3]  ;;  %v14_v22 = vld [vmem:[%s238_s0 + $0x4] sm:$0x3] }
   0x6   :  { %v17_v29 = vld [vmem:[%s238_s0 + $0xa] sm:$0x3]  ;;  %v18_v30 = vld [vmem:[%s238_s0 + $0xc] sm:$0x3]  ;;  %v15_v31 = vld [vmem:[%s238_s0 + $0x6] sm:$0x3] }
   0x7   :  { %v29_v8 = vrot.slane %v20_v0, %v28_v7  ;;  %v36_v10 = vrot.slane %v22_v6, %v28_v7  ;;  %v19_v39 = vld [vmem:[%s238_s0 + $0xe] sm:$0x3]  ;;  %s173_s26 = smov [#allocation2]  }
   0x8   :  { %s133_s27 = sshll.u32 %s173_s26, 4  ;;  %s134_s27 = int_to_ptr.vmem [resolvable:$true] %s133_s27 }
   0x9   :  { %v45_v11 = vrot.slane %v29_v8, %v28_v7  ;;  %v37_v12 = vcombine.high %v29_v8, %v29_v8  ;;  %v52_v13 = vrot.slane %v36_v10, %v28_v7  ;;  %v38_v14 = vcombine.high %v36_v10, %v36_v10  ;;  %s148_s0 = scalar_lea.vmem %s134_s27, 256  ;;  %p153_p1 = scmp.lt.s32.totalorder %s134_s27, %s134_s27 }
   0xa   :  { %p149_p0 = scmp.ne.s32.totalorder %s134_s27, %s148_s0  ;;  %p154_p2 = scmp.lt.s32.totalorder %s148_s0, %s148_s0 }
   0xb   :  { %v74_v16 = vrot.slane %v45_v11, %v73_v9  ;;  %v59_v17 = vrot.slane %v37_v12, %v28_v7  ;;  %v67_v18 = vcombine.high %v45_v11, %v45_v11  ;;  %v90_v20 = vrot.slane %v52_v13, %v73_v9 }
   0xc   :  { %v66_v23 = vrot.slane %v38_v14, %v28_v7  ;;  %v68_v24 = vcombine.high %v52_v13, %v52_v13  ;;  %p155_p3 = por %p154_p2, %p153_p1 }
   0xd   :  { %v111_v25 = vadd.f32 %v74_v16, %v12_v15  ;;  %v78_v26 = vrot.slane %v59_v17, %v73_v9  ;;  %v82_v27 = vrot.slane %v67_v18, %v73_v9  ;;  %v69_v28 = vcombine.high %v59_v17, %v59_v17 }
   0xe   :  { %v115_v32 = vadd.f32 %v90_v20, %v16_v19  ;;  %v94_v33 = vrot.slane %v66_v23, %v73_v9  ;;  %v98_v34 = vrot.slane %v68_v24, %v73_v9  ;;  %v70_v35 = vcombine.high %v66_v23, %v66_v23  ;;  %p156_p4 = pnand %p155_p3, %p149_p0 }
   0xf   :  { %120 = vst.msk [vmem:[#allocation2] sm:$0x3] %vm119_vm0, %v111_v25  ;;  %v112_v36 = vadd.f32 %v78_v26, %v13_v21  ;;  %v113_v37 = vadd.f32 %v82_v27, %v14_v22  ;;  %v86_v38 = vrot.slane %v69_v28, %v73_v9 }
  0x10   :  { %124 = vst.msk [vmem:[#allocation2 + $0x8] sm:$0x3] %vm119_vm0, %v115_v32  ;;  %v116_v40 = vadd.f32 %v94_v33, %v17_v29  ;;  %v117_v41 = vadd.f32 %v98_v34, %v18_v30  ;;  %v102_v42 = vrot.slane %v70_v35, %v73_v9 }
  0x11   :  { %121 = vst.msk [vmem:[#allocation2 + $0x2] sm:$0x3] %vm119_vm0, %v112_v36  ;;  %122 = vst.msk [vmem:[#allocation2 + $0x4] sm:$0x3] %vm119_vm0, %v113_v37  ;;  %v114_v43 = vadd.f32 %v86_v38, %v15_v31 }
  0x12   :  { %125 = vst.msk [vmem:[#allocation2 + $0xa] sm:$0x3] %vm119_vm0, %v116_v40  ;;  %126 = vst.msk [vmem:[#allocation2 + $0xc] sm:$0x3] %vm119_vm0, %v117_v41  ;;  %v118_v44 = vadd.f32 %v102_v42, %v19_v39 }
  0x13   :  { %123 = vst.msk [vmem:[#allocation2 + $0x6] sm:$0x3] %vm119_vm0, %v114_v43 }
  0x14   :  { %127 = vst.msk [vmem:[#allocation2 + $0xe] sm:$0x3] %vm119_vm0, %v118_v44 }
  0x15   :  { %159 = shalt.err (!%p156_p4)
}
  0x16   :  { %s160_s30 = scalar_lea.hbm %s240_s2, 256 }
  0x17   :  { %p161_p5 = scmp.ne.s32.totalorder %s240_s2, %s160_s30  ;;  %p164_p6 = scmp.lt.u32.totalorder %s160_s30, %s240_s2 }
  0x19   :  { %p166_p7 = pnand %p164_p6, %p161_p5 }
  0x1b   :  { %169 = shalt.err (!%p166_p7)
}
  0x1c   :  { %s174_s7 = smov 32   ;;  %s175_s8 = smov 2  }
  0x1d   :  { %139 = dma.vmem_to_hbm [thread:$0]  %s134_s27, 256, %s240_s2, [#allocation3], %s174_s7, %s174_s7, %s175_s8  }
  0x1e   :  { %170 = dma.done.wait [#allocation3], 256  }
  0x1f   :  { %171 = vsyncadd [#allocation3], 4294967040 }
  0x20   :  { %143 = vsyncpa [#allocation3], 1 }

</bundles_post_ra>
